<compile_context>
chip_gen: v6e
topology: v6e:2x2x1
jax: 0.10.0
libtpu: 0.0.40
codegen_flags: <defaults>
</compile_context>

<pallas_src>
import jax
import jax.numpy as jnp
from jax.experimental import pallas as pl
from jax.experimental.pallas import tpu as pltpu


def _excite_scale(x_pooled_sum, w1b, w2):
    """Tiny excite path, all in f32 on the VPU.

    x_pooled_sum: (Nb, C) f32  -- spatial SUM per (image, channel); 1/HW is
                                  already folded into w1b.
    w1b:          (C+1, R) f32 -- rows 0..C-1 = fc1^T with BN scale and 1/HW
                                  folded in; last row = folded BN bias.
    w2:           (C, R)  f32  -- fc2 weight in PyTorch (out=C, in=R) layout.
    Returns (Nb, C) f32 gate values.
    """
    w1t = w1b[:-1, :]                                        # (C, R)
    b1 = w1b[-1:, :]                                         # (1, R)
    # FC1 (+ folded eval-mode BN) + ReLU.  Kept as broadcast-multiply-reduce on
    # the VPU (no MXU) -- negligible FLOPs, hides under the gate's DMA traffic.
    h = jnp.sum(x_pooled_sum[:, :, None] * w1t[None, :, :], axis=1) + b1   # (Nb, R)
    h = jnp.maximum(h, 0.0)
    # FC2 -> per-(image, channel) pre-activation.
    z = jnp.sum(h[:, None, :] * w2[None, :, :], axis=2)                    # (Nb, C)
    # leaky_hsigmoid: min(6, max(a*(z+3), z+3)) / 6 with a = 0.001.
    t = z + 3.0
    return jnp.minimum(6.0, jnp.maximum(0.001 * t, t)) * (1.0 / 6.0)


def _se_kernel_hw_lanes(x_ref, w1b_ref, w2_ref, o_ref):
    # x_ref/o_ref: (Nb, C, HW) -- spatial axis on lanes (used when HW is the
    # more lane-dense axis, e.g. HW % 128 == 0).
    x = x_ref[...]
    # Squeeze: spatial sum, accumulated in f32 (1/HW folded into the weights).
    pooled = jnp.sum(x, axis=2, dtype=jnp.float32)                         # (Nb, C)
    scale = _excite_scale(pooled, w1b_ref[...], w2_ref[...])               # (Nb, C)
    # Gate in the input dtype (no full-size f32 intermediate); lane-dense store.
    o_ref[...] = x * scale[:, :, None].astype(x.dtype)


def _se_kernel_c_lanes(x_ref, w1b_ref, w2_ref, o_ref):
    # x_ref/o_ref: (Nb, HW, C) -- channel axis on lanes (used for awkward HW
    # like 7x7 / 14x14 / 28x28 where HW-on-lanes would be heavily masked).
    x = x_ref[...]
    pooled = jnp.sum(x, axis=1, dtype=jnp.float32)                         # (Nb, C)
    scale = _excite_scale(pooled, w1b_ref[...], w2_ref[...])               # (Nb, C)
    o_ref[...] = x * scale[:, None, :].astype(x.dtype)


def se_module(x, w1, w2, bn_gamma, bn_beta, bn_mean, bn_var, eps=1e-5,
              donate_x=False):
    """x: (N, C, H, W).  w1: (R, C) fc1 weight.  w2: (C, R) fc2 weight.
    BatchNorm2d(R) applied in eval mode (running stats), folded into fc1.
    If donate_x is True the input buffer is reused for the output
    (input_output_aliases) -- only safe when the caller donates x."""
    N, C, H, W = x.shape
    R = w1.shape[0]
    HW = H * W

    # ---- Fold eval-mode BN and the 1/HW of the average pool into fc1.
    #   bn(y) = s*y + (beta - mean*s),  s = gamma / sqrt(var + eps)
    # TODO(synk): training-mode BatchNorm (batch statistics) is not implemented;
    # only eval-mode running-stats semantics are supported (folded on the host).
    s_bn = bn_gamma / jnp.sqrt(bn_var + eps)                               # (R,)
    w1t = (w1 * s_bn[:, None]).T * (1.0 / HW)                              # (C, R)
    b1 = jnp.reshape(bn_beta - bn_mean * s_bn, (1, R))                     # (1, R)
    w1b = jnp.concatenate([w1t, b1], axis=0).astype(jnp.float32)           # (C+1, R)
    w2f = w2.astype(jnp.float32)                                           # (C, R)

    # ---- Pick the lane (last-dim) axis of the heavy read/write path.
    def _lane_util(d):
        return d / (128.0 * pl.cdiv(d, 128))
    hw_on_lanes = _lane_util(HW) >= _lane_util(C)

    itemsize = jnp.dtype(x.dtype).itemsize
    per_image_bytes = C * HW * itemsize

    # ---- Per-generation VMEM budgeting.
    try:
        vmem_cap = int(pltpu.get_tpu_info().vmem_capacity_bytes)
    except Exception:
        vmem_cap = 64 * 1024 * 1024          # conservative (v7x-sized) fallback
    # Target a few MiB of double-buffered traffic per grid step (smaller on v7x).
    target = (6 << 20) if vmem_cap <= (64 << 20) else (12 << 20)

    const_bytes = ((C + 1) * R + C * R) * 4 * 2           # weights (dbl-buffered)
    per_nb = (4 * per_image_bytes                         # in + out, dbl-buffered
              + 2 * C * R * 4                             # VPU excite temps
              + 2 * (C + R) * 4)                          # pooled / hidden rows
    budget = max(target - const_bytes, per_nb)
    nb = int(max(1, min(N, budget // per_nb)))
    while N % nb:                                         # keep the grid exact
        nb -= 1
    # TODO(synk): if a single image exceeds the VMEM budget (huge C*HW), a
    # two-pass C/HW-tiled variant (pool+scale pass, then a parallel gate pass)
    # would be needed; real SE-block shapes never hit this.

    step_bytes = nb * per_nb + const_bytes
    vmem_limit = int(min(max(vmem_cap - (8 << 20), 32 << 20),
                         max(32 << 20, step_bytes + (4 << 20))))

    # ---- Layout + kernel selection (keep the heavy gate path lane-dense).
    if hw_on_lanes:
        x2 = x.reshape(N, C, HW)
        kernel = _se_kernel_hw_lanes
        blk = (nb, C, HW)
    else:
        # Channels-last: one XLA transpose each way, but every vld/vst on the
        # dominant gate path is unmasked for HW like 49/196/784.
        x2 = jnp.swapaxes(x.reshape(N, C, HW), 1, 2)      # (N, HW, C)
        kernel = _se_kernel_c_lanes
        blk = (nb, HW, C)

    grid_spec = pltpu.PrefetchScalarGridSpec(
        num_scalar_prefetch=0,
        grid=(N // nb,),
        in_specs=[
            pl.BlockSpec(blk, lambda n: (n, 0, 0)),          # x (streamed)
            pl.BlockSpec((C + 1, R), lambda n: (0, 0)),      # fc1^T (+BN, +1/HW) | bias
            pl.BlockSpec((C, R), lambda n: (0, 0)),          # fc2
        ],
        out_specs=pl.BlockSpec(blk, lambda n: (n, 0, 0)),
    )

    out2 = pl.pallas_call(
        kernel,
        out_shape=jax.ShapeDtypeStruct(x2.shape, x.dtype),
        grid_spec=grid_spec,
        input_output_aliases={0: 0} if donate_x else {},
        compiler_params=pltpu.CompilerParams(
            dimension_semantics=("parallel",),
            vmem_limit_bytes=vmem_limit,
        ),
    )(x2, w1b, w2f)

    if hw_on_lanes:
        return out2.reshape(N, C, H, W)
    return jnp.swapaxes(out2, 1, 2).reshape(N, C, H, W)


def se_module_ref(x, w1, w2, bn_gamma, bn_beta, bn_mean, bn_var, eps=1e-5):
    """Pure-JAX reference with identical (eval-mode BN) semantics."""
    pooled = jnp.mean(x, axis=(2, 3))                                   # (N, C)
    y = pooled @ w1.T                                                   # (N, R)
    y = bn_gamma * (y - bn_mean) / jnp.sqrt(bn_var + eps) + bn_beta
    y = jnp.maximum(y, 0.0)
    z = y @ w2.T                                                        # (N, C)
    t = z + 3.0
    scale = jnp.minimum(6.0, jnp.maximum(0.001 * t, t)) / 6.0
    return x * scale[:, :, None, None]


if __name__ == "__main__":
    N, C, H, W = 2, 4, 16, 16
    R = max(C // 4, 8)          # reduced_channels = max(in_channels//4, 8) = 8

    key = jax.random.PRNGKey(0)
    kx, k1, k2 = jax.random.split(key, 3)

    x = jax.random.normal(kx, (N, C, H, W), dtype=jnp.float32)
    # Conv2d(C, R, 1, bias=False) weight (1x1 kernel squeezed): (R, C)
    w1 = jax.random.normal(k1, (R, C), dtype=jnp.float32) * 0.1
    # Conv2d(R, C, 1, bias=False) weight (1x1 kernel squeezed): (C, R)
    w2 = jax.random.normal(k2, (C, R), dtype=jnp.float32) * 0.1
    # Deterministic BatchNorm2d(R) parameters / running stats (eval-mode).
    bn_gamma = jnp.linspace(0.9, 1.2, R, dtype=jnp.float32)
    bn_beta = jnp.linspace(-0.05, 0.05, R, dtype=jnp.float32)
    bn_mean = jnp.linspace(-0.02, 0.02, R, dtype=jnp.float32)
    bn_var = jnp.linspace(0.8, 1.1, R, dtype=jnp.float32)

    out = se_module(x, w1, w2, bn_gamma, bn_beta, bn_mean, bn_var)
    out = jax.block_until_ready(out)

    ref = se_module_ref(x, w1, w2, bn_gamma, bn_beta, bn_mean, bn_var)
    assert out.shape == x.shape
    max_err = float(jnp.max(jnp.abs(out - ref)))
    assert max_err < 1e-4, f"mismatch vs reference: {max_err}"
    print("KERNEL_OK")
</pallas_src>

<mosaic_0001>
module attributes {stable_mosaic.version = 11 : i64} {
  func.func @_se_kernel_hw_lanes(%arg0: i32, %arg1: memref<2x4x256xf32, #tpu.memory_space<vmem>>, %arg2: memref<5x8xf32, #tpu.memory_space<vmem>>, %arg3: memref<4x8xf32, #tpu.memory_space<vmem>>, %arg4: memref<2x4x256xf32, #tpu.memory_space<vmem>>) attributes {dimension_semantics = [#tpu.dimension_semantics<parallel>], iteration_bounds = array<i64: 1>, scalar_prefetch = 0 : i64, scratch_operands = 0 : i64, tpu.core_type = #tpu.core_type<tc>, window_params = [{transform_indices = @transform_0, window_bounds = array<i64: 2, 4, 256>}, {pipeline_mode = #tpu.pipeline_mode<synchronous>, transform_indices = @transform_1, window_bounds = array<i64: 5, 8>}, {pipeline_mode = #tpu.pipeline_mode<synchronous>, transform_indices = @transform_2, window_bounds = array<i64: 4, 8>}, {transform_indices = @transform_3, window_bounds = array<i64: 2, 4, 256>}]} {
    %c0 = arith.constant 0 : index
    %c0_0 = arith.constant 0 : index
    %c0_1 = arith.constant 0 : index
    %0 = vector.load %arg1[%c0, %c0_0, %c0_1] : memref<2x4x256xf32, #tpu.memory_space<vmem>>, vector<2x4x256xf32>
    %cst = arith.constant dense<0.000000e+00> : vector<2x4xf32>
    %1 = vector.multi_reduction <add>, %0, %cst [2] : vector<2x4x256xf32> to vector<2x4xf32>
    %c0_2 = arith.constant 0 : index
    %c0_3 = arith.constant 0 : index
    %2 = vector.load %arg2[%c0_2, %c0_3] : memref<5x8xf32, #tpu.memory_space<vmem>>, vector<5x8xf32>
    %c0_4 = arith.constant 0 : index
    %c0_5 = arith.constant 0 : index
    %3 = vector.load %arg3[%c0_4, %c0_5] : memref<4x8xf32, #tpu.memory_space<vmem>>, vector<4x8xf32>
    %4 = vector.extract_strided_slice %2 {offsets = [0, 0], sizes = [4, 8], strides = [1, 1]} : vector<5x8xf32> to vector<4x8xf32>
    %5 = vector.extract_strided_slice %2 {offsets = [4, 0], sizes = [1, 8], strides = [1, 1]} : vector<5x8xf32> to vector<1x8xf32>
    %6 = vector.shape_cast %1 : vector<2x4xf32> to vector<2x4x1xf32>
    %7 = vector.shape_cast %4 : vector<4x8xf32> to vector<1x4x8xf32>
    %8 = vector.broadcast %6 : vector<2x4x1xf32> to vector<2x4x8xf32>
    %9 = vector.broadcast %7 : vector<1x4x8xf32> to vector<2x4x8xf32>
    %10 = arith.mulf %8, %9 : vector<2x4x8xf32>
    %cst_6 = arith.constant dense<0.000000e+00> : vector<2x8xf32>
    %11 = vector.multi_reduction <add>, %10, %cst_6 [1] : vector<2x4x8xf32> to vector<2x8xf32>
    %12 = vector.broadcast %5 : vector<1x8xf32> to vector<2x8xf32>
    %13 = arith.addf %11, %12 : vector<2x8xf32>
    %cst_7 = arith.constant 0.000000e+00 : f32
    %14 = vector.broadcast %cst_7 : f32 to vector<2x8xf32>
    %15 = arith.maximumf %13, %14 : vector<2x8xf32>
    %16 = vector.shape_cast %15 : vector<2x8xf32> to vector<2x1x8xf32>
    %17 = vector.shape_cast %3 : vector<4x8xf32> to vector<1x4x8xf32>
    %18 = vector.broadcast %16 : vector<2x1x8xf32> to vector<2x4x8xf32>
    %19 = vector.broadcast %17 : vector<1x4x8xf32> to vector<2x4x8xf32>
    %20 = arith.mulf %18, %19 : vector<2x4x8xf32>
    %cst_8 = arith.constant dense<0.000000e+00> : vector<2x4xf32>
    %21 = vector.multi_reduction <add>, %20, %cst_8 [2] : vector<2x4x8xf32> to vector<2x4xf32>
    %cst_9 = arith.constant 3.000000e+00 : f32
    %22 = vector.broadcast %cst_9 : f32 to vector<2x4xf32>
    %23 = arith.addf %21, %22 : vector<2x4xf32>
    %cst_10 = arith.constant 1.000000e-03 : f32
    %24 = vector.broadcast %cst_10 : f32 to vector<2x4xf32>
    %25 = arith.mulf %24, %23 : vector<2x4xf32>
    %26 = arith.maximumf %25, %23 : vector<2x4xf32>
    %cst_11 = arith.constant 6.000000e+00 : f32
    %27 = vector.broadcast %cst_11 : f32 to vector<2x4xf32>
    %28 = arith.minimumf %27, %26 : vector<2x4xf32>
    %cst_12 = arith.constant 0.166666672 : f32
    %29 = vector.broadcast %cst_12 : f32 to vector<2x4xf32>
    %30 = arith.mulf %28, %29 : vector<2x4xf32>
    %31 = vector.shape_cast %30 : vector<2x4xf32> to vector<2x4x1xf32>
    %32 = vector.broadcast %31 : vector<2x4x1xf32> to vector<2x4x256xf32>
    %33 = arith.mulf %0, %32 : vector<2x4x256xf32>
    %c0_13 = arith.constant 0 : index
    %c0_14 = arith.constant 0 : index
    %c0_15 = arith.constant 0 : index
    %34 = vector.load %arg4[%c0_13, %c0_14, %c0_15] : memref<2x4x256xf32, #tpu.memory_space<vmem>>, vector<2x4x256xf32>
    tpu.vector_store %arg4[%c0_13, %c0_14, %c0_15], %33 {strides = array<i32>} : memref<2x4x256xf32, #tpu.memory_space<vmem>>, vector<2x4x256xf32>,
    return
  }
  func.func @transform_0(%arg0: i32) -> (i32, i32, i32) {
    %c0_i32 = arith.constant 0 : i32
    %c0_i32_0 = arith.constant 0 : i32
    %c0_i32_1 = arith.constant 0 : i32
    return %arg0, %c0_i32, %c0_i32_0 : i32, i32, i32
  }
  func.func @transform_1(%arg0: i32) -> (i32, i32) {
    %c0_i32 = arith.constant 0 : i32
    %c0_i32_0 = arith.constant 0 : i32
    %c0_i32_1 = arith.constant 0 : i32
    return %c0_i32, %c0_i32_0 : i32, i32
  }
  func.func @transform_2(%arg0: i32) -> (i32, i32) {
    %c0_i32 = arith.constant 0 : i32
    %c0_i32_0 = arith.constant 0 : i32
    %c0_i32_1 = arith.constant 0 : i32
    return %c0_i32, %c0_i32_0 : i32, i32
  }
  func.func @transform_3(%arg0: i32) -> (i32, i32, i32) {
    %c0_i32 = arith.constant 0 : i32
    %c0_i32_0 = arith.constant 0 : i32
    %c0_i32_1 = arith.constant 0 : i32
    return %arg0, %c0_i32, %c0_i32_0 : i32, i32, i32
  }
}

</mosaic_0001>

<bundles_post_ra>
// kernel: tpu_custom_call.1
= control target key start
LH: loop header
LB: loop body
LE: loop exit
PB: predicated region body
PF: predicated region fallthrough
CT: control target
= control target key end

     0   :  { %8 = vsyncpa [#allocation3], 0  ;;  %s320_s0 = inlined_call_operand.hbm [shape: f32[2,4,256], index: 0, kind: input, shape index: {}]   ;;  %s321_s1 = inlined_call_operand.hbm [shape: f32[5,8], index: 1, kind: input, shape index: {}]   ;;  %s322_s2 = inlined_call_operand.hbm [shape: f32[4,8], index: 2, kind: input, shape index: {}]   ;;  %s323_s3 = inlined_call_operand.hbm [shape: f32[2,4,256], index: 3, kind: output, shape index: {}]  }
   0x1   :  { %9 = vsyncpa [#allocation6], 0 }
   0x2   :  { %10 = vsyncpa [#allocation4], 0  ;;  %s259_s12 = smov [#allocation5]   ;;  %s260_s14 = smov [#allocation2]  }
   0x3   :  { %s29_s13 = sshll.u32 %s259_s12, 4  ;;  %s16_s15 = sshll.u32 %s260_s14, 4  ;;  %s30_s13 = int_to_ptr.vmem [resolvable:$true] %s29_s13  ;;  %s17_s15 = int_to_ptr.vmem [resolvable:$true] %s16_s15 }
   0x4   :  { %s181_s16 = scalar_lea.vmem %s30_s13, 128  ;;  %p186_p1 = scmp.lt.s32.totalorder %s30_s13, %s30_s13 }
   0x5   :  { %p182_p0 = scmp.ne.s32.totalorder %s30_s13, %s181_s16  ;;  %p187_p2 = scmp.lt.s32.totalorder %s181_s16, %s181_s16 }
   0x7   :  { %p188_p3 = por %p187_p2, %p186_p1 }
   0x9   :  { %p189_p4 = pnand %p188_p3, %p182_p0 }
   0xb   :  { %192 = shalt.err (!%p189_p4)
}
   0xc   :  { %32 = dma.hbm_to_vmem [thread:$0]  %s321_s1, 128, %s30_s13, [#allocation6]  }
   0xd   :  { %s201_s19 = scalar_lea.vmem %s17_s15, 256  ;;  %p206_p6 = scmp.lt.s32.totalorder %s17_s15, %s17_s15 }
   0xe   :  { %p202_p5 = scmp.ne.s32.totalorder %s17_s15, %s201_s19  ;;  %p207_p7 = scmp.lt.s32.totalorder %s201_s19, %s201_s19 }
  0x10   :  { %p208_p8 = por %p207_p7, %p206_p6 }
  0x12   :  { %p209_p9 = pnand %p208_p8, %p202_p5 }
  0x14   :  { %212 = shalt.err (!%p209_p9)
}
  0x15   :  { %s261_s20 = smov 128   ;;  %s262_s21 = smov 8  }
  0x16   :  { %22 = dma.hbm_to_vmem [thread:$0]  %s320_s0, 256, %s17_s15, [#allocation3], %s261_s20, %s261_s20, %s262_s21  }
  0x17   :  { %s263_s24 = smov [#allocation7]  }
  0x18   :  { %s39_s25 = sshll.u32 %s263_s24, 4  ;;  %s40_s25 = int_to_ptr.vmem [resolvable:$true] %s39_s25 }
  0x19   :  { %s221_s1 = scalar_lea.vmem %s40_s25, 64  ;;  %p226_p11 = scmp.lt.s32.totalorder %s40_s25, %s40_s25 }
  0x1a   :  { %p222_p10 = scmp.ne.s32.totalorder %s40_s25, %s221_s1  ;;  %p227_p12 = scmp.lt.s32.totalorder %s221_s1, %s221_s1 }
  0x1c   :  { %p228_p13 = por %p227_p12, %p226_p11 }
  0x1e   :  { %p229_p0 = pnand %p228_p13, %p222_p10 }
  0x20   :  { %232 = shalt.err (!%p229_p0)
}
  0x21   :  { %42 = dma.hbm_to_vmem [thread:$0]  %s322_s2, 64, %s40_s25, [#allocation6]  }
  0x22   :  { %253 = dma.done.wait [#allocation3], 256  }
  0x23   :  { %254 = vsyncadd [#allocation3], 4294967040 }
  0x24   :  { %255 = dma.done.wait [#allocation6], 192  }
  0x25   :  { %256 = vsyncadd [#allocation6], 4294967104  ;;  %vm60_vm0 = vcmask 1043456   ;;  %v298_v0 = vld [vmem:[#allocation2] sm:$0xff]  ;;  %v300_v1 = vld [vmem:[#allocation2 + $0x8] sm:$0xff]  ;;  %vm75_vm1 = vcmask 60416   ;;  %v90_v11 = vlaneseq }
  0x26   :  { %v56_v2 = vcombine.high %v298_v0, %v298_v0  ;;  %v61_v3 = vsel %vm60_vm0, %v298_v0, 0.0  ;;  %v57_v4 = vcombine.high %v300_v1, %v300_v1  ;;  %v66_v6 = vsel %vm60_vm0, %v300_v1, 0.0  ;;  %v71_v10 = vld [vmem:[#allocation5] sm:$0x1f]  ;;  %v72_v36 = vld [vmem:[#allocation7] sm:$0xf] }
  0x27   :  { %v91_v15 = vshrl.u32 %v90_v11, 7  ;;  %v264_v45 = vmov 839922192   ;;  %s265_s0 = smov [#allocation8]  }
  0x28   :  { %v62_v5 = vsel %vm60_vm0, %v56_v2, 0.0  ;;  %v67_v7 = vsel %vm60_vm0, %v57_v4, 0.0  ;;  %v127_v46 = vunpack.c.l.s4 %v264_v45  ;;  %s151_s2 = sshll.u32 %s265_s0, 4  ;;  %s152_s2 = int_to_ptr.vmem [resolvable:$true] %s151_s2 }
  0x29   :  { %v63_v8 = vadd.f32 %v62_v5, %v61_v3  ;;  %v68_v9 = vadd.f32 %v67_v7, %v66_v6  ;;  %v92_v21 = vsub.s32 4, %v91_v15  ;;  %v100_v33 = vsub.s32 0, %v91_v15  ;;  %s233_s28 = scalar_lea.vmem %s152_s2, 256  ;;  %p238_p2 = scmp.lt.s32.totalorder %s152_s2, %s152_s2 }
  0x2a   :  { %v128_v49 = vunpack.c.0.s8 %v127_v46  ;;  %p234_p1 = scmp.ne.s32.totalorder %s152_s2, %s233_s28  ;;  %p239_p3 = scmp.lt.s32.totalorder %s233_s28, %s233_s28 }
  0x2b   :  { %64 = vadd.xlane.f32.xlu0 %v63_v8  ;;  %v93_v26 = vrot.slane %v71_v10, %v92_v21 }
  0x2c   :  { %v131_v54 = vsub.s32 %v128_v49, %v91_v15  ;;  %p240_p4 = por %p239_p3, %p238_p2 }
  0x2e   :  { %p241_p5 = pnand %p240_p4, %p234_p1 }
  0x2f   :  { %69 = vadd.xlane.f32.xlu0 %v68_v9 }
  0xb4   :  { %v65_v12 = vpop.xlane.xlu0 %64 }
  0xb5   :  { %v73_v13 = vmul.f32 %v71_v10, %v65_v12 }
  0xb7   :  { %v76_v14 = vsel %vm75_vm1, %v73_v13, 0.0 }
  0xb8   :  { %v77_v16 = vrot.slane %v76_v14, 4  ;;  %v70_v17 = vpop.xlane.xlu0 %69 }
  0xb9   :  { %v74_v18 = vmul.f32 %v71_v10, %v70_v17 }
  0xba   :  { %v78_v19 = vadd.f32 %v77_v16, %v76_v14 }
  0xbb   :  { %v83_v20 = vsel %vm75_vm1, %v74_v18, 0.0 }
  0xbc   :  { %v79_v22 = vrot.slane %v78_v19, 2  ;;  %v84_v23 = vrot.slane %v83_v20, 4 }
  0xbe   :  { %v80_v24 = vadd.f32 %v79_v22, %v78_v19  ;;  %v85_v25 = vadd.f32 %v84_v23, %v83_v20 }
  0xc0   :  { %v81_v27 = vrot.slane %v80_v24, 1  ;;  %v86_v28 = vrot.slane %v85_v25, 2 }
  0xc2   :  { %v82_v29 = vadd.f32 %v81_v27, %v80_v24  ;;  %v87_v30 = vadd.f32 %v86_v28, %v85_v25 }
  0xc4   :  { %v88_v31 = vrot.slane %v87_v30, 1  ;;  %v94_v32 = vadd.f32 %v93_v26, %v82_v29 }
  0xc6   :  { %v89_v34 = vadd.f32 %v88_v31, %v87_v30  ;;  %v96_v35 = vmax.f32 %v94_v32, 0.0 }
  0xc8   :  { %v101_v37 = vrot.slane %v96_v35, %v100_v33  ;;  %v95_v38 = vadd.f32 %v93_v26, %v89_v34 }
  0xca   :  { %v106_v39 = vmul.f32 %v101_v37, %v72_v36  ;;  %v97_v40 = vmax.f32 %v95_v38, 0.0 }
  0xcc   :  { %v108_v41 = vsel %vm75_vm1, %v106_v39, 0.0  ;;  %v105_v42 = vrot.slane %v97_v40, %v100_v33 }
  0xcd   :  { %109 = vadd.xlane.f32.xlu1 %v108_v41 }
  0xce   :  { %v107_v43 = vmul.f32 %v105_v42, %v72_v36 }
  0xd0   :  { %v111_v44 = vsel %vm75_vm1, %v107_v43, 0.0 }
  0xd1   :  { %112 = vadd.xlane.f32.xlu1 %v111_v44 }
 0x156   :  { %v110_v47 = vpop.xlane.xlu1 %109 }
 0x157   :  { %v114_v48 = vadd.f32 3.0, %v110_v47 }
 0x159   :  { %v116_v50 = vmul.f32 0.001, %v114_v48 }
 0x15a   :  { %v113_v51 = vpop.xlane.xlu1 %112 }
 0x15b   :  { %v118_v52 = vmax.f32 %v116_v50, %v114_v48  ;;  %v115_v53 = vadd.f32 3.0, %v113_v51 }
 0x15d   :  { %v120_v55 = vmin.f32 %v118_v52, 6.0  ;;  %v117_v56 = vmul.f32 0.001, %v115_v53 }
 0x15f   :  { %v122_v57 = vmul.f32 0.16666667, %v120_v55  ;;  %v119_v58 = vmax.f32 %v117_v56, %v115_v53 }
 0x161   :  { %v132_v59 = vrot.slane %v122_v57, %v131_v54  ;;  %v121_v60 = vmin.f32 %v119_v58, 6.0 }
 0x163   :  { %v123_v61 = vmul.f32 0.16666667, %v121_v60  ;;  %v142_v62 = vmul.f32 %v132_v59, %v298_v0 }
 0x165   :  { %v139_v63 = vrot.slane %v123_v61, %v131_v54  ;;  %144 = vst [vmem:[#allocation8] sm:$0xff] %v142_v62 }
 0x167   :  { %v143_v2 = vmul.f32 %v139_v63, %v300_v1 }
 0x169   :  { %145 = vst [vmem:[#allocation8 + $0x8] sm:$0xff] %v143_v2 }
 0x16a   :  { %244 = shalt.err (!%p241_p5)
}
 0x16b   :  { %157 = dma.vmem_to_hbm [thread:$0]  %s152_s2, 256, %s323_s3, [#allocation4], %s261_s20, %s261_s20, %s262_s21  }
 0x16c   :  { %257 = dma.done.wait [#allocation4], 256  }
 0x16d   :  { %258 = vsyncadd [#allocation4], 4294967040 }
 0x16e   :  { %161 = vsyncpa [#allocation3], 1 }
 0x16f   :  { %162 = vsyncpa [#allocation6], 1 }
 0x170   :  { %163 = vsyncpa [#allocation4], 1 }

</bundles_post_ra>
